<compile_context>
chip_gen: v5e
topology: v5e:2x2
jax: 0.10.0
libtpu: 0.0.40
codegen_flags: <defaults>
</compile_context>

<pallas_src>
import jax
import jax.numpy as jnp
from jax.experimental import pallas as pl
from jax.experimental.pallas import tpu as pltpu

_MiB = 1 << 20


def _round_up(x, m):
    return ((x + m - 1) // m) * m


def _vmem_budget_bytes():
    """Generation-aware VMEM budget (~54 MiB on v7x, ~108 MiB on v5e/v6e)."""
    try:
        info = pltpu.get_tpu_info()
        cap = getattr(info, "vmem_capacity_bytes", None)
        if cap:
            return int(min(cap - 8 * _MiB, int(cap * 0.85)))
    except Exception:
        pass
    return 48 * _MiB


# ----------------------------------------------------------------------------
# Kernel 1: tiled matmul + bias  (fc encoder, and the hoisted LSTM input proj)
# ----------------------------------------------------------------------------
def _matmul_bias_kernel(x_ref, w_ref, b_ref, o_ref):
    acc = jnp.dot(x_ref[...], w_ref[...], preferred_element_type=jnp.float32)
    o_ref[...] = (acc + b_ref[...]).astype(o_ref.dtype)


def _pick_tile_m(M, K, Hc, x_bytes, o_bytes, w_bytes, budget):
    """Largest multiple-of-16 M-tile that keeps the double-buffered working set
    comfortably inside the VMEM budget (bigger tiles on 128-MiB chips)."""
    target = 1024 if budget >= 96 * _MiB else 512
    tm = max(16, min(target, _round_up(M, 16)))

    def vmem_cost(t):
        # x + out double-buffered, weight + bias (index-invariant, counted x2 anyway)
        return 2 * t * (K * x_bytes + Hc * o_bytes) + 2 * K * Hc * w_bytes

    while tm > 16 and vmem_cost(tm) > budget // 2:
        tm = max(16, (tm // 2) // 16 * 16)
    return tm


def matmul_bias_pallas(x2d, w, b, out_dtype=jnp.float32, budget=None):
    """(M, K) @ (K, Hc) + b -> (M, Hc). M is padded to a multiple of the tile and
    the tail sliced off afterwards, so there is never a single-giant-block fallback."""
    budget = int(budget if budget is not None else _vmem_budget_bytes())
    M, K = x2d.shape
    Hc = w.shape[1]
    tm = _pick_tile_m(M, K, Hc, x2d.dtype.itemsize,
                      jnp.dtype(out_dtype).itemsize, w.dtype.itemsize, budget)
    Mp = _round_up(M, tm)
    if Mp != M:
        x2d = jnp.pad(x2d, ((0, Mp - M), (0, 0)))
    out = pl.pallas_call(
        _matmul_bias_kernel,
        out_shape=jax.ShapeDtypeStruct((Mp, Hc), out_dtype),
        grid=(Mp // tm,),
        in_specs=[
            pl.BlockSpec((tm, K), lambda i: (i, 0)),
            pl.BlockSpec((K, Hc), lambda i: (0, 0)),
            pl.BlockSpec((1, Hc), lambda i: (0, 0)),
        ],
        out_specs=pl.BlockSpec((tm, Hc), lambda i: (i, 0)),
        compiler_params=pltpu.CompilerParams(
            dimension_semantics=("parallel",),
            vmem_limit_bytes=budget,
        ),
    )(x2d, w, b.reshape(1, Hc))
    return out[:M] if Mp != M else out


# ----------------------------------------------------------------------------
# Kernel 2: fused bidirectional LSTM recurrence (one layer), N-tiled
# ----------------------------------------------------------------------------
def _bilstm_kernel(gx_ref, whh_ref, o_ref, h_scr, c_scr):
    # grid axis 0 = direction (0 fwd, 1 bwd); grid axis 1 = batch (N) tile.
    d = pl.program_id(0)
    T = gx_ref.shape[0]
    Hp = h_scr.shape[1]

    h_scr[...] = jnp.zeros_like(h_scr)
    c_scr[...] = jnp.zeros_like(c_scr)
    whh = whh_ref[0]                      # (Hp, 4*Hp) bf16 — hoisted out of the loop

    def step(i, carry):
        t = i + d * (T - 1 - 2 * i)       # d==0 -> i ; d==1 -> T-1-i
        # x @ W_ih (+ both biases) was precomputed into gx (bf16); only h @ W_hh
        # remains on the serial critical path (bf16 operands, f32 accumulate).
        gates = gx_ref[t].astype(jnp.float32) + jnp.dot(
            h_scr[...].astype(whh.dtype), whh, preferred_element_type=jnp.float32)
        # Each gate occupies its own 128-lane-aligned, Hp-wide column block.
        # PyTorch gate order: i, f, g, o.
        i_g = jax.nn.sigmoid(gates[:, 0 * Hp:1 * Hp])
        f_g = jax.nn.sigmoid(gates[:, 1 * Hp:2 * Hp])
        g_g = jnp.tanh(gates[:, 2 * Hp:3 * Hp])
        o_g = jax.nn.sigmoid(gates[:, 3 * Hp:4 * Hp])
        c_new = f_g * c_scr[...] + i_g * g_g
        h_new = o_g * jnp.tanh(c_new)
        c_scr[...] = c_new
        h_scr[...] = h_new
        o_ref[t] = h_new.astype(o_ref.dtype)   # lane-dense 128-wide store
        return carry

    unroll = True if T <= 8 else (4 if T % 4 == 0 else (2 if T % 2 == 0 else 1))
    jax.lax.fori_loop(0, T, step, 0, unroll=unroll)


def _choose_tn(T, N, Hp, budget):
    """Batch (N) tile for the recurrence: multiple of 16, fits half the VMEM budget
    with the whole T resident (gx bf16 + out f32, both double-buffered)."""
    per_n = T * (4 * Hp * 2 * 2 + Hp * 4 * 2) + 2 * Hp * 4
    fit = max(16, int((budget // 2) // max(per_n, 1)) // 16 * 16)
    tn = min(256, fit, _round_up(N, 16))
    return max(16, tn // 16 * 16)


def bilstm_layer_pallas(gx, whh_stacked, tn, budget):
    """gx: (T, N_pad, 8*Hp) bf16 input pre-activations (fwd gates | bwd gates).
    whh_stacked: (2, Hp, 4*Hp) bf16. Returns (T, N_pad, 2*Hp) f32 = [fwd_h | bwd_h]."""
    T, N_pad, eight_hp = gx.shape
    Hp = eight_hp // 8
    assert N_pad % tn == 0
    return pl.pallas_call(
        _bilstm_kernel,
        out_shape=jax.ShapeDtypeStruct((T, N_pad, 2 * Hp), jnp.float32),
        grid=(2, N_pad // tn),
        in_specs=[
            pl.BlockSpec((T, tn, 4 * Hp), lambda d, n: (0, n, d)),   # this dir's gx tile
            pl.BlockSpec((1, Hp, 4 * Hp), lambda d, n: (d, 0, 0)),   # this dir's W_hh
        ],
        out_specs=pl.BlockSpec((T, tn, Hp), lambda d, n: (0, n, d)),
        scratch_shapes=[
            pltpu.VMEM((tn, Hp), jnp.float32),   # h state
            pltpu.VMEM((tn, Hp), jnp.float32),   # c state
        ],
        compiler_params=pltpu.CompilerParams(
            # Both axes are independent: v7x can split them across its two TCs;
            # on v5e/v6e pipelining comes from the N-tiling axis.
            dimension_semantics=("parallel", "parallel"),
            vmem_limit_bytes=int(budget),
        ),
    )(gx, whh_stacked)


# ----------------------------------------------------------------------------
# Parameter packing helpers (done once at init, plain JAX)
# ----------------------------------------------------------------------------
def _pad_gate_cols(a, H, Hp):
    """(..., 4H) -> (..., 4Hp): each gate's column block zero-padded to Hp lanes."""
    lead = a.shape[:-1]
    a4 = a.reshape(lead + (4, H))
    out = jnp.zeros(lead + (4, Hp), a.dtype).at[..., :H].set(a4)
    return out.reshape(lead + (4 * Hp,))


def _embed_rows_bidir(a, H, Hp):
    """(2H, X) -> (2Hp, X): rows [0:H] -> [0:H], rows [H:2H] -> [Hp:Hp+H]."""
    out = jnp.zeros((2 * Hp, a.shape[1]), a.dtype)
    out = out.at[0:H].set(a[0:H])
    out = out.at[Hp:Hp + H].set(a[H:2 * H])
    return out


def _pad_rows(a, Hp):
    """(H, X) -> (Hp, X), zero-padded rows."""
    out = jnp.zeros((Hp, a.shape[1]), a.dtype)
    return out.at[: a.shape[0]].set(a)


# ----------------------------------------------------------------------------
# Pure-JAX reference (correctness checking only)
# ----------------------------------------------------------------------------
def _lstm_direction_ref(x_seq, wih, whh, b, reverse):
    T, N, _ = x_seq.shape
    H = whh.shape[0]

    def step(carry, x_t):
        h, c = carry
        gates = x_t @ wih + h @ whh + b
        i_g = jax.nn.sigmoid(gates[:, 0 * H:1 * H])
        f_g = jax.nn.sigmoid(gates[:, 1 * H:2 * H])
        g_g = jnp.tanh(gates[:, 2 * H:3 * H])
        o_g = jax.nn.sigmoid(gates[:, 3 * H:4 * H])
        c = f_g * c + i_g * g_g
        h = o_g * jnp.tanh(c)
        return (h, c), h

    init = (jnp.zeros((N, H), jnp.float32), jnp.zeros((N, H), jnp.float32))
    xs = x_seq[::-1] if reverse else x_seq
    _, hs = jax.lax.scan(step, init, xs)
    return hs[::-1] if reverse else hs


# ----------------------------------------------------------------------------
# SequenceEncoder wrapper with deterministic parameter init
# ----------------------------------------------------------------------------
class SequenceEncoderPallas:
    def __init__(self, in_channels, encoder_type, hidden_size=48, key=None):
        assert encoder_type in ("fc", "rnn")
        self.encoder_type = encoder_type
        self.in_channels = in_channels
        self.hidden_size = hidden_size
        self.vmem_budget = _vmem_budget_bytes()
        key = jax.random.PRNGKey(0) if key is None else key

        def uni(k, shape, scale):
            return jax.random.uniform(k, shape, jnp.float32, -scale, scale)

        if encoder_type == "fc":
            k1, k2 = jax.random.split(key)
            s = 1.0 / (in_channels ** 0.5)
            self.w_fc = uni(k1, (in_channels, hidden_size), s)   # (C, H), raw
            self.b_fc = uni(k2, (hidden_size,), s)
            # lane-dense padded copies for the kernel (128-wide output stores)
            Hpad = _round_up(hidden_size, 128)
            self.Hpad_fc = Hpad
            self.w_fc_p = jnp.zeros((in_channels, Hpad), jnp.float32).at[:, :hidden_size].set(self.w_fc)
            self.b_fc_p = jnp.zeros((Hpad,), jnp.float32).at[:hidden_size].set(self.b_fc)
            self.out_channels = hidden_size
            return

        # 'rnn': 2-layer bidirectional LSTM, PyTorch gate order (i, f, g, o).
        H = hidden_size
        Hp = _round_up(H, 128)                 # pad hidden dim to full 128-lane blocks
        self.Hp = Hp
        s = 1.0 / (H ** 0.5)
        sizes = [(in_channels, H), (2 * H, H)]  # per-layer input sizes
        self.rnn_raw = []                       # unpadded f32 params (reference)
        self.rnn_packed = []                    # padded / fused params (kernels)
        for li, (isz, hsz) in enumerate(sizes):
            raw = []
            for _d in range(2):                 # 0: forward, 1: backward
                key, k1, k2, k3 = jax.random.split(key, 4)
                raw.append(dict(
                    wih=uni(k1, (isz, 4 * hsz), s),   # (I, 4H) pre-transposed
                    whh=uni(k2, (hsz, 4 * hsz), s),   # (H, 4H) pre-transposed
                    b=uni(k3, (4 * hsz,), s),         # b_ih + b_hh combined
                ))
            self.rnn_raw.append(raw)

            wih_p, b_p, whh_p = [], [], []
            for dd in range(2):
                wih = _pad_gate_cols(raw[dd]["wih"], H, Hp)        # (I, 4Hp)
                if li > 0:
                    # layer-1 input is the *padded* (2Hp) output of layer 0
                    wih = _embed_rows_bidir(wih, H, Hp)            # (2Hp, 4Hp)
                wih_p.append(wih)
                b_p.append(_pad_gate_cols(raw[dd]["b"], H, Hp))    # (4Hp,)
                whh_p.append(_pad_rows(_pad_gate_cols(raw[dd]["whh"], H, Hp), Hp))
            self.rnn_packed.append(dict(
                # bf16 matmul operands (f32 accumulate in the kernels); bias stays f32.
                wih_both=jnp.concatenate(wih_p, axis=1).astype(jnp.bfloat16),   # (I_pad, 8Hp)
                b_both=jnp.concatenate(b_p, axis=0),                            # (8Hp,) f32
                whh_stacked=jnp.stack(whh_p, axis=0).astype(jnp.bfloat16),      # (2, Hp, 4Hp)
            ))
        self.out_channels = 2 * hidden_size

    # ---- Im2Seq glue ----
    @staticmethod
    def _im2seq(x):
        # x: (B, C, 1, W) -> (B, W, C)
        x = jnp.squeeze(x, axis=2)
        return jnp.transpose(x, (0, 2, 1))

    def __call__(self, x):
        seq = self._im2seq(x)                                # (B, W, C)
        if self.encoder_type == "fc":
            B, W, C = seq.shape
            y = matmul_bias_pallas(seq.reshape(B * W, C), self.w_fc_p, self.b_fc_p,
                                   out_dtype=jnp.float32, budget=self.vmem_budget)
            return y[:, :self.hidden_size].reshape(B, W, self.hidden_size)

        # 'rnn': nn.LSTM(batch_first=False) fed (B, W, C) -> time axis = B, batch = W.
        H, Hp = self.hidden_size, self.Hp
        h = seq                                              # (T=B, N=W, C)
        T, N = h.shape[0], h.shape[1]
        tn = _choose_tn(T, N, Hp, self.vmem_budget)
        N_pad = _round_up(N, tn)
        if N_pad != N:
            # padded batch rows see zero gx and provably stay zero through the recurrence
            h = jnp.pad(h, ((0, 0), (0, N_pad - N), (0, 0)))
        for p in self.rnn_packed:
            # 1) hoisted input projection: one big parallel bf16 MXU matmul for both
            #    directions, biases folded in, gate columns 128-lane padded; gx in bf16.
            gx = matmul_bias_pallas(
                h.reshape(T * N_pad, h.shape[2]).astype(jnp.bfloat16),
                p["wih_both"], p["b_both"],
                out_dtype=jnp.bfloat16, budget=self.vmem_budget)
            gx = gx.reshape(T, N_pad, 8 * Hp)
            # 2) fused bidirectional recurrence, N-tiled, whole T resident per tile.
            h = bilstm_layer_pallas(gx, p["whh_stacked"], tn=tn,
                                    budget=self.vmem_budget)  # (T, N_pad, 2*Hp) f32
        # strip lane + batch padding once at the very end (plain JAX).
        return jnp.concatenate([h[:, :N, :H], h[:, :N, Hp:Hp + H]], axis=-1)

    # pure-JAX f32 reference of the same forward pass
    def reference(self, x):
        seq = self._im2seq(x)
        if self.encoder_type == "fc":
            return seq @ self.w_fc + self.b_fc
        h = seq
        for layer in self.rnn_raw:
            hf = _lstm_direction_ref(h, layer[0]["wih"], layer[0]["whh"],
                                     layer[0]["b"], reverse=False)
            hb = _lstm_direction_ref(h, layer[1]["wih"], layer[1]["whh"],
                                     layer[1]["b"], reverse=True)
            h = jnp.concatenate([hf, hb], axis=-1)
        return h


if __name__ == "__main__":
    B, C, W, HIDDEN = 2, 16, 8, 48   # HIDDEN=48 is the module default
    x = jax.random.normal(jax.random.PRNGKey(0), (B, C, 1, W), dtype=jnp.float32)

    # fc encoder (stays f32; lane-dense padded output)
    enc_fc = SequenceEncoderPallas(C, "fc", hidden_size=HIDDEN,
                                   key=jax.random.PRNGKey(1))
    y_fc = jax.block_until_ready(enc_fc(x))
    assert y_fc.shape == (B, W, HIDDEN)
    assert jnp.allclose(y_fc, enc_fc.reference(x), atol=1e-3, rtol=1e-3)

    # rnn encoder (2-layer bidirectional LSTM; bf16 matmuls, f32 state/accumulate)
    enc_rnn = SequenceEncoderPallas(C, "rnn", hidden_size=HIDDEN,
                                    key=jax.random.PRNGKey(2))
    y_rnn = jax.block_until_ready(enc_rnn(x))
    assert y_rnn.shape == (B, W, 2 * HIDDEN)
    assert jnp.allclose(y_rnn, enc_rnn.reference(x), atol=2e-2, rtol=2e-2)

    print("KERNEL_OK")
</pallas_src>

<mosaic_0001>
module attributes {stable_mosaic.version = 11 : i64} {
  func.func @_matmul_bias_kernel(%arg0: i32, %arg1: memref<16x16xf32, #tpu.memory_space<vmem>>, %arg2: memref<16x128xf32, #tpu.memory_space<vmem>>, %arg3: memref<1x128xf32, #tpu.memory_space<vmem>>, %arg4: memref<16x128xf32, #tpu.memory_space<vmem>>) attributes {dimension_semantics = [#tpu.dimension_semantics<parallel>], iteration_bounds = array<i64: 1>, scalar_prefetch = 0 : i64, scratch_operands = 0 : i64, tpu.core_type = #tpu.core_type<tc>, window_params = [{transform_indices = @transform_0, window_bounds = array<i64: 16, 16>}, {pipeline_mode = #tpu.pipeline_mode<synchronous>, transform_indices = @transform_1, window_bounds = array<i64: 16, 128>}, {pipeline_mode = #tpu.pipeline_mode<synchronous>, transform_indices = @transform_2, window_bounds = array<i64: 1, 128>}, {transform_indices = @transform_3, window_bounds = array<i64: 16, 128>}]} {
    %c0 = arith.constant 0 : index
    %c0_0 = arith.constant 0 : index
    %0 = vector.load %arg1[%c0, %c0_0] : memref<16x16xf32, #tpu.memory_space<vmem>>, vector<16x16xf32>
    %c0_1 = arith.constant 0 : index
    %c0_2 = arith.constant 0 : index
    %1 = vector.load %arg2[%c0_1, %c0_2] : memref<16x128xf32, #tpu.memory_space<vmem>>, vector<16x128xf32>
    %cst = arith.constant dense<0.000000e+00> : vector<16x128xf32>
    %2 = tpu.matmul %0, %1, %cst {dimension_numbers = #tpu.dot_dimension_numbers<[1], [0], [0], [1], [0, 0, 1, 1], [], []>} : vector<16x16xf32>, vector<16x128xf32>, vector<16x128xf32> -> vector<16x128xf32>
    %c0_3 = arith.constant 0 : index
    %c0_4 = arith.constant 0 : index
    %3 = vector.load %arg3[%c0_3, %c0_4] : memref<1x128xf32, #tpu.memory_space<vmem>>, vector<1x128xf32>
    %4 = vector.broadcast %3 : vector<1x128xf32> to vector<16x128xf32>
    %5 = arith.addf %2, %4 : vector<16x128xf32>
    %c0_5 = arith.constant 0 : index
    %c0_6 = arith.constant 0 : index
    %6 = vector.load %arg4[%c0_5, %c0_6] : memref<16x128xf32, #tpu.memory_space<vmem>>, vector<16x128xf32>
    tpu.vector_store %arg4[%c0_5, %c0_6], %5 {strides = array<i32>} : memref<16x128xf32, #tpu.memory_space<vmem>>, vector<16x128xf32>,
    return
  }
  func.func @transform_0(%arg0: i32) -> (i32, i32) {
    %c0_i32 = arith.constant 0 : i32
    %c0_i32_0 = arith.constant 0 : i32
    return %arg0, %c0_i32 : i32, i32
  }
  func.func @transform_1(%arg0: i32) -> (i32, i32) {
    %c0_i32 = arith.constant 0 : i32
    %c0_i32_0 = arith.constant 0 : i32
    %c0_i32_1 = arith.constant 0 : i32
    return %c0_i32, %c0_i32_0 : i32, i32
  }
  func.func @transform_2(%arg0: i32) -> (i32, i32) {
    %c0_i32 = arith.constant 0 : i32
    %c0_i32_0 = arith.constant 0 : i32
    %c0_i32_1 = arith.constant 0 : i32
    return %c0_i32, %c0_i32_0 : i32, i32
  }
  func.func @transform_3(%arg0: i32) -> (i32, i32) {
    %c0_i32 = arith.constant 0 : i32
    %c0_i32_0 = arith.constant 0 : i32
    return %arg0, %c0_i32 : i32, i32
  }
}

</mosaic_0001>

<bundles_post_ra>
// kernel: tpu_custom_call.1
= control target key start
LH: loop header
LB: loop body
LE: loop exit
PB: predicated region body
PF: predicated region fallthrough
CT: control target
= control target key end

     0   :  { %8 = vsyncpa [#allocation3], 0  ;;  %s241_s0 = inlined_call_operand.hbm [shape: f32[16,16], index: 0, kind: input, shape index: {}]   ;;  %s242_s1 = inlined_call_operand.hbm [shape: f32[16,128], index: 1, kind: input, shape index: {}]   ;;  %s243_s2 = inlined_call_operand.vmem [shape: f32[1,128], index: 2, kind: input, shape index: {}]   ;;  %s244_s3 = inlined_call_operand.hbm [shape: f32[16,128], index: 3, kind: output, shape index: {}]  }
   0x1   :  { %9 = vsyncpa [#allocation6], 0 }
   0x2   :  { %10 = vsyncpa [#allocation4], 0  ;;  %s15_s14 = sshll.u32 %s241_s0, 4  ;;  %s195_s15 = smov [#allocation2]   ;;  %s16_s14 = int_to_ptr.hbm [resolvable:$true] %s15_s14 }
   0x3   :  { %s17_s16 = sshll.u32 %s195_s15, 4  ;;  %s28_s19 = sshll.u32 %s242_s1, 4  ;;  %s18_s16 = int_to_ptr.vmem [resolvable:$true] %s17_s16  ;;  %s29_s19 = int_to_ptr.hbm [resolvable:$true] %s28_s19 }
   0x4   :  { %s196_s20 = smov 128   ;;  %s197_s21 = smov 8  }
   0x5   :  { %23 = dma.hbm_to_vmem [thread:$0]  %s16_s14, 256, %s18_s16, [#allocation3], %s196_s20, %s196_s20, %s197_s21  }
   0x6   :  { %s198_s22 = smov [#allocation5]  }
   0x7   :  { %s30_s23 = sshll.u32 %s198_s22, 4  ;;  %s31_s23 = int_to_ptr.vmem [resolvable:$true] %s30_s23 }
   0x8   :  { %36 = dma.hbm_to_vmem [thread:$0]  %s29_s19, 256, %s31_s23, [#allocation6], %s196_s20, %s196_s20, %s197_s21  }
   0x9   :  { %189 = dma.done.wait [#allocation3], 256  }
   0xa   :  { %190 = vsyncadd [#allocation3], 4294967040 }
   0xb   :  { %191 = dma.done.wait [#allocation6], 256  }
   0xc   :  { %192 = vsyncadd [#allocation6], 4294967040  ;;  %v50_v0 = vld [vmem:[#allocation5 + $0x8] sm:$0xff]  ;;  %v49_v1 = vld [vmem:[#allocation5] sm:$0xff]  ;;  %vm55_vm0 = vcmask 130048   ;;  %s199_s24 = smov [#allocation7]  }
   0xd   :  { %76 = vmatpush.msra.mxu0 %v50_v0  ;;  %109 = vmatpush.msra.mxu1 %v50_v0  ;;  %v47_v2 = vld [vmem:[#allocation2] sm:$0xff]  ;;  %v48_v3 = vld [vmem:[#allocation2 + $0x8] sm:$0xff]  ;;  %s91_s25 = sshll.u32 %s199_s24, 4  ;;  %s93_s28 = sshll.u32 %s244_s3, 4  ;;  %s92_s25 = int_to_ptr.vmem [resolvable:$true] %s91_s25  ;;  %s94_s28 = int_to_ptr.hbm [resolvable:$true] %s93_s28 }
   0xe   :  { %v116_v4 = vld [vmem:[%s243_s2] ss:$0 sm:$0xff] }
   0xf   :  { %77 = vmatpush.msra.mxu0 %v49_v1  ;;  %110 = vmatpush.msra.mxu1 %v49_v1 }
  0x10   :  { %107 = vmatmul.msk.f32.vlgmr.msra.gmra.mxu0 %vm55_vm0, %v47_v2  ;;  %108 = vmatmul.msk.f32.vlgmr.msra.gmra.mxu1 %vm55_vm0, %v48_v3 }
  0x8d   :  { %v79_v5 = vpop.f32.mrf.mxu0  ;;  %v82_v6 = vpop.f32.mrf.mxu1 }
  0x8e   :  { %v80_v7 = vadd.f32 %v116_v4, %v79_v5  ;;  %v83_v8 = vadd.f32 %v116_v4, %v82_v6 }
  0x90   :  { %85 = vst [vmem:[#allocation7] sm:$0xff] %v80_v7 }
  0x91   :  { %86 = vst [vmem:[#allocation7 + $0x8] sm:$0xff] %v83_v8 }
  0x92   :  { %99 = dma.vmem_to_hbm [thread:$0]  %s92_s25, 256, %s94_s28, [#allocation4], %s196_s20, %s196_s20, %s197_s21  }
  0x93   :  { %193 = dma.done.wait [#allocation4], 256  }
  0x94   :  { %194 = vsyncadd [#allocation4], 4294967040 }
  0x95   :  { %104 = vsyncpa [#allocation3], 1 }
  0x96   :  { %105 = vsyncpa [#allocation6], 1 }
  0x97   :  { %106 = vsyncpa [#allocation4], 1 }

</bundles_post_ra>
